<compile_context>
chip_gen: v7x
topology: tpu7x:2x2x1
jax: 0.10.0
libtpu: 0.0.40
codegen_flags: <defaults>
</compile_context>

<pallas_src>
import functools
import math

import jax
import jax.numpy as jnp
from jax.experimental import pallas as pl
from jax.experimental.pallas import tpu as pltpu

HIDDEN_SIZE = 32           # args.hidden_size
NUM_SDN_SAMPLE = 5         # args.num_sdn_sample
FIXED_LOGSTD = -1.20397    # args.fixed_policy_logstd
LANES = 128                # slab lane padding (unmasked loads / DMA)


# --------------------------------------------------------------------------------------
# Parameter packing (done once, outside the kernel): one 8-row-aligned, 128-lane slab.
# --------------------------------------------------------------------------------------
def pack_params(params, hidden=HIDDEN_SIZE):
    """Pack all weights/biases (with head fusion) into one [R, 128] f32 slab + offsets."""
    H = hidden

    # Fused first layer: actor_fc1 | sdn_fc_states  (sdn action bias folded into state bias)
    w_state = jnp.concatenate([params["w1"], params["ws"]], axis=1)                  # [dS, 2H]
    b_state = jnp.concatenate([params["b1"], params["bs"] + params["ba"]], axis=1)   # [1, 2H]
    # Fused heads: actor_mean | critic_state_value | (actor_mean @ wa) composed weight
    w_head = jnp.concatenate(
        [params["wm"], params["wv"], params["wm"] @ params["wa"]], axis=1)           # [H, dA+1+H]
    b_head = jnp.concatenate(
        [params["bm"], params["bv"], params["bm"] @ params["wa"]], axis=1)           # [1, dA+1+H]

    weight_sections = [
        w_state,            # o_wstate
        params["w2"],       # o_w2
        w_head,             # o_whead
        params["wa"],       # o_wa
        params["wh"],       # o_wh
        params["wadv"],     # o_wadv
    ]

    def pad_section(a):
        r, c = a.shape
        rows = ((r + 7) // 8) * 8                       # 8-sublane aligned section start
        return jnp.pad(a, ((0, rows - r), (0, LANES - c)))

    padded = [pad_section(a) for a in weight_sections]

    # One consolidated 8x128 bias tile; rows 0..4 = b_state, b2, b_head, bh, badv.
    bias_rows = [b_state, params["b2"], b_head, params["bh"], params["badv"]]
    bias_tile = jnp.zeros((8, LANES), jnp.float32)
    for i, b in enumerate(bias_rows):
        bias_tile = bias_tile.at[i, : b.shape[1]].set(b[0])
    padded.append(bias_tile)                            # o_bias

    offsets, off = [], 0
    for a in padded:
        offsets.append(off)
        off += a.shape[0]
    slab = jnp.concatenate(padded, axis=0).astype(jnp.float32)   # [R, 128]
    return slab, tuple(offsets)


# --------------------------------------------------------------------------------------
# Kernel: 6 matmuls, no VMEM scratch, 1 reduction, 1 packed output store.
# --------------------------------------------------------------------------------------
def _actor_critic_kernel(states_ref, actions_ref, noise_ref, slab_ref, out_ref, *,
                         B, dS, dA, H, offs):
    (o_wstate, o_w2, o_whead, o_wa, o_wh, o_wadv, o_bias) = offs
    std = jnp.float32(math.exp(FIXED_LOGSTD))

    states = states_ref[...]                                     # [B, dS]

    # ---- fused first layer: actor_fc1 | sdn_fc_states (+bs+ba) ----
    w_state = slab_ref[o_wstate:o_wstate + dS, 0:2 * H]
    b_state = slab_ref[o_bias + 0:o_bias + 1, 0:2 * H]
    sp = jnp.dot(states, w_state, preferred_element_type=jnp.float32) + b_state   # [B, 2H]
    x1 = jnp.maximum(sp[:, 0:H], 0.0)                            # actor trunk hidden-1
    s_contrib = sp[:, H:2 * H]                                   # states@ws + bs + ba (pre-relu)

    # ---- actor_fc2 ----
    w2 = slab_ref[o_w2:o_w2 + H, 0:H]
    b2 = slab_ref[o_bias + 1:o_bias + 2, 0:H]
    x2 = jnp.maximum(jnp.dot(x1, w2, preferred_element_type=jnp.float32) + b2, 0.0)

    # ---- fused heads: actor_mean | critic_state_value | actor_mean @ wa ----
    w_head = slab_ref[o_whead:o_whead + H, 0:dA + 1 + H]
    b_head = slab_ref[o_bias + 2:o_bias + 3, 0:dA + 1 + H]
    head = jnp.dot(x2, w_head, preferred_element_type=jnp.float32) + b_head       # [B, dA+1+H]
    actor_mean = head[:, 0:dA]                                   # [B, dA]
    csv = head[:, dA:dA + 1]                                     # [B, 1]
    mean_contrib = head[:, dA + 1:dA + 1 + H]                    # actor_mean @ wa  [B, H]

    # ---- stacked SDN (SSA values only, no VMEM round-trip) ----
    # rows 0..B-1   : real actions
    # rows B..6B-1  : sampled actions = actor_mean + std*noise  (mean part comes in via
    #                 the composed head term mean_contrib, added below)
    a_stack = jnp.concatenate([actions_ref[...], std * noise_ref[...]], axis=0)   # [6B, dA]
    wa = slab_ref[o_wa:o_wa + dA, 0:H]
    samp_base = s_contrib + mean_contrib
    add_term = jnp.concatenate([s_contrib] + [samp_base] * NUM_SDN_SAMPLE, axis=0)  # [6B, H]
    h1 = jnp.maximum(
        jnp.dot(a_stack, wa, preferred_element_type=jnp.float32) + add_term, 0.0)   # [6B, H]

    wh = slab_ref[o_wh:o_wh + H, 0:H]
    bh = slab_ref[o_bias + 3:o_bias + 4, 0:H]
    h2 = jnp.maximum(jnp.dot(h1, wh, preferred_element_type=jnp.float32) + bh, 0.0)

    wadv = slab_ref[o_wadv:o_wadv + H, 0:1]
    badv = slab_ref[o_bias + 4:o_bias + 5, 0:1]
    adv_all = jnp.dot(h2, wadv, preferred_element_type=jnp.float32) + badv        # [6B, 1]

    advantages = adv_all[0:B, :]                                 # real-action advantages
    sample_mean = jnp.sum(adv_all[B:, :]) / jnp.float32(NUM_SDN_SAMPLE * B)

    # ---- single packed output store: [ mean | csv | cav ] ----
    out_ref[...] = jnp.concatenate(
        [actor_mean, csv, csv + advantages - sample_mean], axis=1)


# --------------------------------------------------------------------------------------
# Wrapper
# --------------------------------------------------------------------------------------
def actor_critic_forward(states, actions, noise, param_slab, offs):
    """Returns (actor_mean, actor_logstd, critic_state_value, critic_action_value)."""
    B, dS = states.shape
    dA = actions.shape[1]
    H = HIDDEN_SIZE

    # Unscaled standard-normal draws; scale and stacking happen inside the kernel.
    noise_flat = noise.reshape(NUM_SDN_SAMPLE * B, dA)           # layout no-op reshape

    kernel = functools.partial(_actor_critic_kernel, B=B, dS=dS, dA=dA, H=H, offs=offs)
    vmem = pl.BlockSpec(memory_space=pltpu.MemorySpace.VMEM)

    n_stack = (NUM_SDN_SAMPLE + 1) * B
    flops = 2 * (B * dS * 2 * H + B * H * H + B * H * (dA + 1 + H)
                 + n_stack * (dA * H + H * H + H))
    bytes_accessed = 4 * (states.size + actions.size + noise_flat.size
                          + param_slab.size + B * (dA + 2))

    out = pl.pallas_call(
        kernel,
        out_shape=jax.ShapeDtypeStruct((B, dA + 2), jnp.float32),
        in_specs=[vmem, vmem, vmem, vmem],
        out_specs=vmem,
        cost_estimate=pl.CostEstimate(
            flops=flops, transcendentals=0, bytes_accessed=bytes_accessed),
    )(states, actions, noise_flat, param_slab)

    actor_mean = out[:, 0:dA]
    actor_logstd = jnp.full((B, dA), FIXED_LOGSTD, jnp.float32)  # compile-time constant
    critic_state_value = out[:, dA:dA + 1]
    critic_action_value = out[:, dA + 1:dA + 2]
    return actor_mean, actor_logstd, critic_state_value, critic_action_value


# --------------------------------------------------------------------------------------
# Init + pure-JAX reference (mirrors the PyTorch forward exactly, unfused)
# --------------------------------------------------------------------------------------
def init_params(key, dim_states, dim_actions, hidden=HIDDEN_SIZE):
    def linear(k, fan_in, fan_out):
        kw, kb = jax.random.split(k)
        bound = 1.0 / math.sqrt(fan_in)
        w = jax.random.uniform(kw, (fan_in, fan_out), jnp.float32, -bound, bound)
        b = jax.random.uniform(kb, (1, fan_out), jnp.float32, -bound, bound)
        return w, b

    ks = jax.random.split(key, 8)
    p = {}
    p["w1"], p["b1"] = linear(ks[0], dim_states, hidden)       # actor_fc1
    p["w2"], p["b2"] = linear(ks[1], hidden, hidden)           # actor_fc2
    p["wm"], p["bm"] = linear(ks[2], hidden, dim_actions)      # actor_mean_layer
    p["wv"], p["bv"] = linear(ks[3], hidden, 1)                # critic_state_value_layer
    p["ws"], p["bs"] = linear(ks[4], dim_states, hidden)       # sdn_fc_states
    p["wa"], p["ba"] = linear(ks[5], dim_actions, hidden)      # sdn_fc_actions
    p["wh"], p["bh"] = linear(ks[6], hidden, hidden)           # sdn_fc_hidden
    p["wadv"], p["badv"] = linear(ks[7], hidden, 1)            # sdn_fc_advantages
    return p


def reference_forward(states, actions, noise, params):
    def lin(x, w, b):
        return x @ w + b

    def sdn(st, ac):
        h = jax.nn.relu(lin(st, params["ws"], params["bs"]) + lin(ac, params["wa"], params["ba"]))
        h = jax.nn.relu(lin(h, params["wh"], params["bh"]))
        return lin(h, params["wadv"], params["badv"])

    x = jax.nn.relu(lin(states, params["w1"], params["b1"]))
    x = jax.nn.relu(lin(x, params["w2"], params["b2"]))
    actor_mean = lin(x, params["wm"], params["bm"])
    actor_logstd = jnp.full_like(actor_mean, FIXED_LOGSTD)
    csv = lin(x, params["wv"], params["bv"])
    adv = sdn(states, actions)
    samples = []
    for i in range(NUM_SDN_SAMPLE):
        a_i = actor_mean + jnp.exp(actor_logstd) * noise[i]
        samples.append(sdn(states, a_i))
    sample_adv = jnp.concatenate(samples, axis=0)
    cav = csv + adv - sample_adv.mean()
    return actor_mean, actor_logstd, csv, cav


if __name__ == "__main__":
    # Hopper-like small shapes: dim_states=11, dim_actions=3, batch=8 (sublane-aligned).
    B, DIM_STATES, DIM_ACTIONS = 8, 11, 3

    key = jax.random.PRNGKey(0)
    k_params, k_states, k_actions, k_noise = jax.random.split(key, 4)

    params = init_params(k_params, DIM_STATES, DIM_ACTIONS)
    states = jax.random.normal(k_states, (B, DIM_STATES), jnp.float32)
    actions = jax.random.normal(k_actions, (B, DIM_ACTIONS), jnp.float32)
    # TODO(synk): torch.normal sampling is replaced by precomputed standard-normal noise
    # so the Monte-Carlo draws are deterministic and shared with the reference.
    noise = jax.random.normal(k_noise, (NUM_SDN_SAMPLE, B, DIM_ACTIONS), jnp.float32)

    # Pack parameters once (outside the kernel hot path).
    param_slab, offs = pack_params(params)

    # Jit the wrapper so the kernel fuses with the tiny surrounding JAX ops.
    fwd = jax.jit(actor_critic_forward, static_argnums=(4,))
    outs = fwd(states, actions, noise, param_slab, offs)
    outs = jax.block_until_ready(outs)

    refs = reference_forward(states, actions, noise, params)
    for o, r in zip(outs, refs):
        assert o.shape == r.shape and o.dtype == r.dtype
        assert jnp.allclose(o, r, atol=1e-4, rtol=1e-4), (o, r)

    print("KERNEL_OK")
</pallas_src>

<mosaic_0001>
module attributes {stable_mosaic.version = 11 : i64} {
  func.func @_actor_critic_kernel(%arg0: memref<8x11xf32, #tpu.memory_space<vmem>>, %arg1: memref<8x3xf32, #tpu.memory_space<vmem>>, %arg2: memref<40x3xf32, #tpu.memory_space<vmem>>, %arg3: memref<160x128xf32, #tpu.memory_space<vmem>>, %arg4: memref<8x5xf32, #tpu.memory_space<vmem>>) attributes {dimension_semantics = [], scalar_prefetch = 0 : i64, scratch_operands = 0 : i64, tpu.core_type = #tpu.core_type<tc>} {
    %c0 = arith.constant 0 : index
    %c0_0 = arith.constant 0 : index
    %0 = vector.load %arg0[%c0, %c0_0] : memref<8x11xf32, #tpu.memory_space<vmem>>, vector<8x11xf32>
    %c0_1 = arith.constant 0 : index
    %c0_2 = arith.constant 0 : index
    %1 = vector.load %arg3[%c0_1, %c0_2] : memref<160x128xf32, #tpu.memory_space<vmem>>, vector<11x64xf32>
    %c152 = arith.constant 152 : index
    %c0_3 = arith.constant 0 : index
    %2 = vector.load %arg3[%c152, %c0_3] : memref<160x128xf32, #tpu.memory_space<vmem>>, vector<1x64xf32>
    %cst = arith.constant dense<0.000000e+00> : vector<8x64xf32>
    %3 = tpu.matmul %0, %1, %cst {dimension_numbers = #tpu.dot_dimension_numbers<[1], [0], [0], [1], [0, 0, 1, 1], [], []>} : vector<8x11xf32>, vector<11x64xf32>, vector<8x64xf32> -> vector<8x64xf32>
    %4 = vector.broadcast %2 : vector<1x64xf32> to vector<8x64xf32>
    %5 = arith.addf %3, %4 : vector<8x64xf32>
    %6 = vector.extract_strided_slice %5 {offsets = [0, 0], sizes = [8, 32], strides = [1, 1]} : vector<8x64xf32> to vector<8x32xf32>
    %cst_4 = arith.constant 0.000000e+00 : f32
    %7 = vector.broadcast %cst_4 : f32 to vector<8x32xf32>
    %8 = arith.maximumf %6, %7 : vector<8x32xf32>
    %9 = vector.extract_strided_slice %5 {offsets = [0, 32], sizes = [8, 32], strides = [1, 1]} : vector<8x64xf32> to vector<8x32xf32>
    %c16 = arith.constant 16 : index
    %c0_5 = arith.constant 0 : index
    %10 = vector.load %arg3[%c16, %c0_5] : memref<160x128xf32, #tpu.memory_space<vmem>>, vector<32x32xf32>
    %c153 = arith.constant 153 : index
    %c0_6 = arith.constant 0 : index
    %11 = vector.load %arg3[%c153, %c0_6] : memref<160x128xf32, #tpu.memory_space<vmem>>, vector<1x32xf32>
    %cst_7 = arith.constant dense<0.000000e+00> : vector<8x32xf32>
    %12 = tpu.matmul %8, %10, %cst_7 {dimension_numbers = #tpu.dot_dimension_numbers<[1], [0], [0], [1], [0, 0, 1, 1], [], []>} : vector<8x32xf32>, vector<32x32xf32>, vector<8x32xf32> -> vector<8x32xf32>
    %13 = vector.broadcast %11 : vector<1x32xf32> to vector<8x32xf32>
    %14 = arith.addf %12, %13 : vector<8x32xf32>
    %cst_8 = arith.constant 0.000000e+00 : f32
    %15 = vector.broadcast %cst_8 : f32 to vector<8x32xf32>
    %16 = arith.maximumf %14, %15 : vector<8x32xf32>
    %c48 = arith.constant 48 : index
    %c0_9 = arith.constant 0 : index
    %17 = vector.load %arg3[%c48, %c0_9] : memref<160x128xf32, #tpu.memory_space<vmem>>, vector<32x36xf32>
    %c154 = arith.constant 154 : index
    %c0_10 = arith.constant 0 : index
    %18 = vector.load %arg3[%c154, %c0_10] : memref<160x128xf32, #tpu.memory_space<vmem>>, vector<1x36xf32>
    %cst_11 = arith.constant dense<0.000000e+00> : vector<8x36xf32>
    %19 = tpu.matmul %16, %17, %cst_11 {dimension_numbers = #tpu.dot_dimension_numbers<[1], [0], [0], [1], [0, 0, 1, 1], [], []>} : vector<8x32xf32>, vector<32x36xf32>, vector<8x36xf32> -> vector<8x36xf32>
    %20 = vector.broadcast %18 : vector<1x36xf32> to vector<8x36xf32>
    %21 = arith.addf %19, %20 : vector<8x36xf32>
    %22 = vector.extract_strided_slice %21 {offsets = [0, 0], sizes = [8, 3], strides = [1, 1]} : vector<8x36xf32> to vector<8x3xf32>
    %23 = vector.extract_strided_slice %21 {offsets = [0, 3], sizes = [8, 1], strides = [1, 1]} : vector<8x36xf32> to vector<8x1xf32>
    %24 = vector.extract_strided_slice %21 {offsets = [0, 4], sizes = [8, 32], strides = [1, 1]} : vector<8x36xf32> to vector<8x32xf32>
    %c0_12 = arith.constant 0 : index
    %c0_13 = arith.constant 0 : index
    %25 = vector.load %arg1[%c0_12, %c0_13] : memref<8x3xf32, #tpu.memory_space<vmem>>, vector<8x3xf32>
    %c0_14 = arith.constant 0 : index
    %c0_15 = arith.constant 0 : index
    %26 = vector.load %arg2[%c0_14, %c0_15] : memref<40x3xf32, #tpu.memory_space<vmem>>, vector<40x3xf32>
    %cst_16 = arith.constant 0.300000846 : f32
    %27 = vector.broadcast %cst_16 : f32 to vector<40x3xf32>
    %28 = arith.mulf %27, %26 : vector<40x3xf32>
    %29 = tpu.concatenate %25, %28 in 0 : vector<8x3xf32>, vector<40x3xf32> -> vector<48x3xf32>
    %c80 = arith.constant 80 : index
    %c0_17 = arith.constant 0 : index
    %30 = vector.load %arg3[%c80, %c0_17] : memref<160x128xf32, #tpu.memory_space<vmem>>, vector<3x32xf32>
    %31 = arith.addf %9, %24 : vector<8x32xf32>
    %32 = tpu.concatenate %9, %31, %31, %31, %31, %31 in 0 : vector<8x32xf32>, vector<8x32xf32>, vector<8x32xf32>, vector<8x32xf32>, vector<8x32xf32>, vector<8x32xf32> -> vector<48x32xf32>
    %cst_18 = arith.constant dense<0.000000e+00> : vector<48x32xf32>
    %33 = tpu.matmul %29, %30, %cst_18 {dimension_numbers = #tpu.dot_dimension_numbers<[1], [0], [0], [1], [0, 0, 1, 1], [], []>} : vector<48x3xf32>, vector<3x32xf32>, vector<48x32xf32> -> vector<48x32xf32>
    %34 = arith.addf %33, %32 : vector<48x32xf32>
    %cst_19 = arith.constant 0.000000e+00 : f32
    %35 = vector.broadcast %cst_19 : f32 to vector<48x32xf32>
    %36 = arith.maximumf %34, %35 : vector<48x32xf32>
    %c88 = arith.constant 88 : index
    %c0_20 = arith.constant 0 : index
    %37 = vector.load %arg3[%c88, %c0_20] : memref<160x128xf32, #tpu.memory_space<vmem>>, vector<32x32xf32>
    %c155 = arith.constant 155 : index
    %c0_21 = arith.constant 0 : index
    %38 = vector.load %arg3[%c155, %c0_21] : memref<160x128xf32, #tpu.memory_space<vmem>>, vector<1x32xf32>
    %cst_22 = arith.constant dense<0.000000e+00> : vector<48x32xf32>
    %39 = tpu.matmul %36, %37, %cst_22 {dimension_numbers = #tpu.dot_dimension_numbers<[1], [0], [0], [1], [0, 0, 1, 1], [], []>} : vector<48x32xf32>, vector<32x32xf32>, vector<48x32xf32> -> vector<48x32xf32>
    %40 = vector.broadcast %38 : vector<1x32xf32> to vector<48x32xf32>
    %41 = arith.addf %39, %40 : vector<48x32xf32>
    %cst_23 = arith.constant 0.000000e+00 : f32
    %42 = vector.broadcast %cst_23 : f32 to vector<48x32xf32>
    %43 = arith.maximumf %41, %42 : vector<48x32xf32>
    %c120 = arith.constant 120 : index
    %c0_24 = arith.constant 0 : index
    %44 = vector.load %arg3[%c120, %c0_24] : memref<160x128xf32, #tpu.memory_space<vmem>>, vector<32x1xf32>
    %c156 = arith.constant 156 : index
    %c0_25 = arith.constant 0 : index
    %45 = vector.load %arg3[%c156, %c0_25] : memref<160x128xf32, #tpu.memory_space<vmem>>, vector<1x1xf32>
    %cst_26 = arith.constant dense<0.000000e+00> : vector<48x1xf32>
    %46 = tpu.matmul %43, %44, %cst_26 {dimension_numbers = #tpu.dot_dimension_numbers<[1], [0], [0], [1], [0, 0, 1, 1], [], []>} : vector<48x32xf32>, vector<32x1xf32>, vector<48x1xf32> -> vector<48x1xf32>
    %47 = vector.broadcast %45 : vector<1x1xf32> to vector<48x1xf32>
    %48 = arith.addf %46, %47 : vector<48x1xf32>
    %49 = vector.extract_strided_slice %48 {offsets = [0, 0], sizes = [8, 1], strides = [1, 1]} : vector<48x1xf32> to vector<8x1xf32>
    %50 = vector.extract_strided_slice %48 {offsets = [8, 0], sizes = [40, 1], strides = [1, 1]} : vector<48x1xf32> to vector<40x1xf32>
    %51 = vector.shape_cast %50 : vector<40x1xf32> to vector<1x40x1xf32>
    %cst_27 = arith.constant dense<0.000000e+00> : vector<1xf32>
    %52 = vector.multi_reduction <add>, %51, %cst_27 [1, 2] : vector<1x40x1xf32> to vector<1xf32>
    %53 = vector.shape_cast %52 : vector<1xf32> to vector<1x1x1xf32>
    %54 = vector.extract %53[0, 0, 0] : f32 from vector<1x1x1xf32>
    %cst_28 = arith.constant 4.000000e+01 : f32
    %55 = arith.divf %54, %cst_28 : f32
    %56 = arith.addf %23, %49 : vector<8x1xf32>
    %57 = vector.broadcast %55 : f32 to vector<8x1xf32>
    %58 = arith.subf %56, %57 : vector<8x1xf32>
    %59 = tpu.concatenate %22, %23, %58 in 1 : vector<8x3xf32>, vector<8x1xf32>, vector<8x1xf32> -> vector<8x5xf32>
    %c0_29 = arith.constant 0 : index
    %c0_30 = arith.constant 0 : index
    %60 = vector.load %arg4[%c0_29, %c0_30] : memref<8x5xf32, #tpu.memory_space<vmem>>, vector<8x5xf32>
    tpu.vector_store %arg4[%c0_29, %c0_30], %59 {strides = array<i32>} : memref<8x5xf32, #tpu.memory_space<vmem>>, vector<8x5xf32>,
    return
  }
}

</mosaic_0001>

<bundles_post_ra>
// kernel: actor_critic_forward.1
= control target key start
LH: loop header
LB: loop body
LE: loop exit
PB: predicated region body
PF: predicated region fallthrough
CT: control target
= control target key end

     0   :  { %9 = vsyncpa [#allocation3], 0  ;;  %s935_s15 = smov [#allocation2]   ;;  %s1038_s0 = inlined_call_operand.vmem [shape: f32[8,11], index: 0, kind: input, shape index: {}]   ;;  %s1039_s1 = inlined_call_operand.vmem [shape: f32[8,3], index: 1, kind: input, shape index: {}]   ;;  %s1040_s2 = inlined_call_operand.vmem [shape: f32[40,3], index: 2, kind: input, shape index: {}]   ;;  %s1041_s3 = inlined_call_operand.hbm [shape: f32[160,128], index: 3, kind: input, shape index: {}]   ;;  %s1042_s4 = inlined_call_operand.vmem [shape: f32[8,5], index: 4, kind: output, shape index: {}]  }
   0x1   :  { %s21_s16 = sshll.u32 %s935_s15, 4  ;;  %s911_s19 = scalar_lea.hbm %s1041_s3, 2560  ;;  %s22_s16 = int_to_ptr.vmem [resolvable:$true] %s21_s16 }
   0x2   :  { %p912_p0 = scmp.ne.s32.totalorder %s1041_s3, %s911_s19  ;;  %p915_p1 = scmp.lt.u32.totalorder %s911_s19, %s1041_s3 }
   0x4   :  { %p917_p2 = pnand %p915_p1, %p912_p0 }
   0x6   :  { %920 = shalt.err (!%p917_p2)
}
   0x7   :  { %s921_s24 = scalar_lea.vmem %s22_s16, 2560  ;;  %p926_p4 = scmp.lt.s32.totalorder %s22_s16, %s22_s16 }
   0x8   :  { %p922_p3 = scmp.ne.s32.totalorder %s22_s16, %s921_s24  ;;  %p927_p5 = scmp.lt.s32.totalorder %s921_s24, %s921_s24 }
   0xa   :  { %p928_p6 = por %p927_p5, %p926_p4 }
   0xc   :  { %p929_p7 = pnand %p928_p6, %p922_p3 }
   0xe   :  { %932 = shalt.err (!%p929_p7)
}
   0xf   :  { %s936_s25 = smov 128   ;;  %s937_s26 = smov 8  }
  0x10   :  { %27 = dma.hbm_to_vmem [thread:$0]  %s1041_s3, 2560, %s22_s16, [#allocation3], %s936_s25, %s936_s25, %s937_s26  }
  0x11   :  { %933 = dma.done.wait [#allocation3], 2560  }
  0x12   :  { %934 = vsyncadd [#allocation3], 4294964736  ;;  %v938_v0 = vmov 0.0|0.0   ;;  %vm939_vm0 = vmmov 0   ;;  %v940_v1 = vmov 0.0   ;;  %vm43_vm1 = vcmask 1042432  }
  0x13   :  { %866 = vmatprep.subr.bf16.mxu0 %v938_v0  ;;  %870 = vmatprep.subr.bf16.mxu1 %v938_v0  ;;  %v32_v2 = vld [vmem:[#allocation2] sm:$0xff]  ;;  %v33_v3 = vld [vmem:[#allocation2 + $0x8] sm:$0x7]  ;;  %vm941_vm2 = vmmov 1   ;;  %v118_v5 = vld [vmem:[#allocation2 + $0x10] sm:$0xff]  ;;  %vm39_vm4 = vcmask 89088  }
  0x14   :  { %796 = vmatprep.mubr.msk.f32.mxu0 %vm939_vm0, %v940_v1  ;;  %807 = vmatprep.mubr.msk.f32.mxu1 %vm939_vm0, %v940_v1  ;;  %vm868_vm3 = vmpackc.low %vm43_vm1, %vm941_vm2  ;;  %v867_v4 = vpack.c.bf16 %v33_v3, %v32_v2  ;;  %v119_v6 = vld [vmem:[#allocation2 + $0x18] sm:$0xff]  ;;  %v31_v8 = vld [vmem:[%s1038_s0] sm:$0xff]  ;;  %vm127_vm5 = vcmask 261120   ;;  %vm309_vm6 = vcmask 23552   ;;  %s943_s14 = smov 96   ;;  %s944_s15 = smov 3  }
  0x15   :  { %v871_v7 = vpack.c.bf16 %v119_v6, %v118_v5  ;;  %v120_v9 = vld [vmem:[#allocation2 + $0x20] sm:$0xff]  ;;  %v121_v10 = vld [vmem:[#allocation2 + $0x28] sm:$0xff]  ;;  %v202_v12 = vld [vmem:[#allocation2 + $0x30] sm:$0xff]  ;;  %vm682_vm7 = vcmask 7168   ;;  %s945_s18 = smov 1   ;;  %vm715_vm8 = vcmask 31744  }
  0x16   :  { %869 = vmatpush3.bf16.msk.msra.mxu0 %vm868_vm3, %v867_v4  ;;  %v874_v11 = vpack.c.bf16 %v121_v10, %v120_v9  ;;  %v203_v13 = vld [vmem:[#allocation2 + $0x38] sm:$0xff]  ;;  %v204_v20 = vld [vmem:[#allocation2 + $0x40] sm:$0xff]  ;;  %v205_v21 = vld [vmem:[#allocation2 + $0x48] sm:$0xff]  ;;  %vm717_vm9 = vcmask 39936  }
  0x17   :  { %872 = vmatpush3.bf16.msra.mxu1 %v871_v7  ;;  %876 = vmatprep.subr.bf16.mxu0 %v938_v0  ;;  %v877_v14 = vpack.c.bf16 %v203_v13, %v202_v12  ;;  %v724_v15 = vld [vmem:[#allocation2 + $0x98] ss:$0 sm:$0xff]  ;;  %v880_v22 = vpack.c.bf16 %v205_v21, %v204_v20  ;;  %v295_v23 = vld [vmem:[#allocation2 + $0x50] sm:$0x7]  ;;  %v284_v24 = vld [vmem:[%s1039_s1] sm:$0xff] }
  0x18   :  { %873 = vmatprep.subr.bf16.mxu1 %v938_v0  ;;  %v285_v25 = vld [vmem:[%s1040_s2] sm:$0xff]  ;;  %v727_v27 = vld [vmem:[#allocation2 + $0x99] ss:$0 sm:$0xff]  ;;  %v286_v32 = vld [vmem:[%s1040_s2 + $0x8] sm:$0xff] }
  0x19   :  { %797 = vmatmul.mubr.msk.f32.vlgmr.msra.gmra.mrb[0].mxu0 %vm39_vm4, %v31_v8  ;;  %v290_v26 = vmul.f32 0.30000085, %v285_v25  ;;  %v287_v33 = vld [vmem:[%s1040_s2 + $0x10] sm:$0xff]  ;;  %v288_v34 = vld [vmem:[%s1040_s2 + $0x18] sm:$0xff]  ;;  %v291_v35 = vmul.f32 0.30000085, %v286_v32 }
  0x1a   :  { %818 = vmatprep.mubr.msk.f32.mxu0 %vm939_vm0, %v940_v1  ;;  %878 = vmatpush3.bf16.msra.mxu0 %v877_v14  ;;  %v292_v36 = vmul.f32 0.30000085, %v287_v33  ;;  %v293_v37 = vmul.f32 0.30000085, %v288_v34  ;;  %v289_v38 = vld [vmem:[%s1040_s2 + $0x20] sm:$0xff]  ;;  %v432_v43 = vld [vmem:[#allocation2 + $0x58] sm:$0xff] }
  0x1b   :  { %875 = vmatpush3.bf16.msra.mxu1 %v874_v11  ;;  %879 = vmatprep.subr.bf16.mxu0 %v938_v0  ;;  %v294_v39 = vmul.f32 0.30000085, %v289_v38  ;;  %v729_v42 = vld [vmem:[#allocation2 + $0x9a] ss:$0 sm:$0xff]  ;;  %v433_v44 = vld [vmem:[#allocation2 + $0x60] sm:$0xff]  ;;  %s942_s2 = smov 28  }
  0x1c   :  { %821 = vmatprep.subr.msk.mxu1 %vm43_vm1, %v295_v23  ;;  %v882_v45 = vpack.c.bf16 %v433_v44, %v432_v43  ;;  %v434_v53 = vld [vmem:[#allocation2 + $0x68] sm:$0xff]  ;;  %v435_v54 = vld [vmem:[#allocation2 + $0x70] sm:$0xff]  ;;  %v560_v58 = vld [vmem:[#allocation2 + $0x78] sm:$0xff] }
  0x1d   :  { %v886_v55 = vpack.c.bf16 %v435_v54, %v434_v53  ;;  %v561_v59 = vld [vmem:[#allocation2 + $0x80] sm:$0xff]  ;;  %v562_v11 = vld [vmem:[#allocation2 + $0x88] sm:$0xff]  ;;  %v563_v12 = vld [vmem:[#allocation2 + $0x90] sm:$0xff] }
  0x1e   :  { %881 = vmatpush3.bf16.msra.mxu0 %v880_v22  ;;  %v890_v60 = vpack.c.bf16 %v561_v59, %v560_v58  ;;  %v894_v13 = vpack.c.bf16 %v563_v12, %v562_v11  ;;  %v738_v14 = vld [vmem:[#allocation2 + $0x9b] ss:$0 sm:$0xff]  ;;  %v745_v33 = vld [vmem:[#allocation2 + $0x9c] ss:$0 sm:$0xff] }
  0x1f   :  { %883 = vmatprep.subr.bf16.mxu0 %v882_v45 }
  0xec   :  { %v113_v16 = vpop.f32.mrb[0].mxu0 }
  0xed   :  { %v114_v17 = vadd.f32 %v724_v15, %v113_v16  ;;  %v798_v18 = vpop.f32.mrb[1].mxu0 }
  0xef   :  { %v117_v19 = vmax.f32 %v114_v17, 0.0 }
  0xf1   :  { %808 = vmatmul.mubr.msk.f32.vlgmr.msra.gmra.mrb[0].mxu1 %vm127_vm5, %v117_v19 }
  0xf2   :  { %823 = vmatprep.mubr.msk.f32.mxu1 %vm309_vm6, %v284_v24  ;;  %822 = vmatpush3.msk.msra.mxu1 %vm43_vm1, %v295_v23 }
  0xf3   :  { %891 = vmatprep.subr.bf16.mxu1 %v890_v60 }
  0xf5   :  { %824 = vmatmul.mubr.msk.f32.vlgmr.msra.gmra.mrb[2].mxu1 %vm309_vm6, %v290_v26 }
  0xf6   :  { %826 = vmatprep.mubr.msk.f32.mxu1 %vm309_vm6, %v291_v35  ;;  %893 = vmatpush3.bf16.msra.mxu1 %v890_v60 }
  0xf7   :  { %895 = vmatprep.subr.bf16.mxu1 %v894_v13 }
  0xf9   :  { %827 = vmatmul.mubr.msk.f32.gmra.mrb[4].mxu1 %vm309_vm6, %v292_v36 }
  0xfa   :  { %829 = vmatprep.mubr.msk.f32.mxu1 %vm309_vm6, %v293_v37  ;;  %897 = vmatpush3.bf16.msra.mxu1 %v894_v13 }
  0xfd   :  { %830 = vmatmul.mubr.msk.f32.gmra.mrb[6].mxu1 %vm309_vm6, %v294_v39 }
 0x1c4   :  { %v197_v28 = vpop.f32.mrb[0].mxu1 }
 0x1c5   :  { %v198_v29 = vadd.f32 %v727_v27, %v197_v28  ;;  %v809_v30 = vpop.f32.mrb[1].mxu1 }
 0x1c7   :  { %v201_v31 = vmax.f32 %v198_v29, 0.0 }
 0x1c8   :  { %v825_v40 = vpop.f32.mrb[2].mxu1 }
 0x1c9   :  { %819 = vmatmul.mubr.msk.f32.vlgmr.msra.gmra.mrb[2].mxu0 %vm127_vm5, %v201_v31  ;;  %v397_v41 = vpop.f32.mrb[3].mxu1 }
 0x1ca   :  { %885 = vmatpush3.bf16.msra.mxu0 %v882_v45 }
 0x1cb   :  { %887 = vmatprep.subr.bf16.mxu0 %v886_v55 }
 0x1cc   :  { %v828_v49 = vpop.f32.mrb[4].mxu1 }
 0x1cd   :  { %v407_v50 = vpop.f32.mrb[5].mxu1 }
 0x1ce   :  { %889 = vmatpush3.bf16.msra.mxu0 %v886_v55 }
 0x1d0   :  { %v831_v51 = vpop.f32.mrb[6].mxu1 }
 0x1d1   :  { %v417_v52 = vpop.f32.mrb[7].mxu1 }
 0x29c   :  { %v280_v46 = vpop.f32.mrb[2].mxu0 }
 0x29d   :  { %v1018_v47 = vadd.f32 %v729_v42, %v280_v46  ;;  %v820_v48 = vpop.f32.mrb[3].mxu0 }
 0x29f   :  { %297 = vrot.lane.b32.xlu0 %v1018_v47, %s942_s2 }
 0x2a3   :  { %303 = vrot.lane.b32.xlu0 %v114_v17, %s943_s14 }
 0x311   :  { %v298_v56 = vpop.permute.xlu0 %297 }
 0x312   :  { %v300_v57 = vadd.f32 %v298_v56, %v114_v17 }
 0x314   :  { %305 = vrot.lane.b32.xlu1 %v300_v57, %s943_s14 }
 0x315   :  { %v304_v61 = vpop.permute.xlu0 %303 }
 0x316   :  { %v398_v62 = vadd.f32 %v397_v41, %v304_v61 }
 0x318   :  { %v426_v63 = vmax.f32 %v398_v62, 0.0 }
 0x31a   :  { %840 = vmatprep.mubr.msk.f32.mxu0 %vm127_vm5, %v426_v63 }
 0x386   :  { %v306_v0 = vpop.permute.xlu1 %305 }
 0x387   :  { %v403_v1 = vadd.f32 %v825_v40, %v306_v0  ;;  %v408_v2 = vadd.f32 %v407_v50, %v306_v0  ;;  %v413_v5 = vadd.f32 %v828_v49, %v306_v0  ;;  %v418_v6 = vadd.f32 %v417_v52, %v306_v0 }
 0x388   :  { %v423_v8 = vadd.f32 %v831_v51, %v306_v0 }
 0x389   :  { %v427_v3 = vmax.f32 %v403_v1, 0.0  ;;  %v428_v4 = vmax.f32 %v408_v2, 0.0  ;;  %v429_v7 = vmax.f32 %v413_v5, 0.0  ;;  %v430_v9 = vmax.f32 %v418_v6, 0.0 }
 0x38a   :  { %v431_v10 = vmax.f32 %v423_v8, 0.0 }
 0x38b   :  { %841 = vmatmul.mubr.msk.f32.vlgmr.msra.gmra.mrb[4].mxu0 %vm127_vm5, %v427_v3 }
 0x38c   :  { %843 = vmatprep.mubr.msk.f32.mxu0 %vm127_vm5, %v428_v4 }
 0x38f   :  { %844 = vmatmul.mubr.msk.f32.gmra.mrb[6].mxu0 %vm127_vm5, %v429_v7 }
 0x390   :  { %846 = vmatprep.mubr.msk.f32.mxu0 %vm127_vm5, %v430_v9 }
 0x393   :  { %847 = vmatmul.mubr.msk.f32.gmra.mrb[8].mxu0 %vm127_vm5, %v431_v10 }
 0x45e   :  { %v842_v15 = vpop.f32.mrb[4].mxu0 }
 0x45f   :  { %v531_v16 = vadd.f32 %v842_v15, %v738_v14  ;;  %v525_v17 = vpop.f32.mrb[5].mxu0 }
 0x460   :  { %v526_v18 = vadd.f32 %v738_v14, %v525_v17 }
 0x461   :  { %v555_v21 = vmax.f32 %v531_v16, 0.0 }
 0x462   :  { %v554_v19 = vmax.f32 %v526_v18, 0.0  ;;  %v845_v20 = vpop.f32.mrb[6].mxu0 }
 0x463   :  { %v541_v22 = vadd.f32 %v845_v20, %v738_v14  ;;  %v535_v23 = vpop.f32.mrb[7].mxu0 }
 0x464   :  { %v536_v24 = vadd.f32 %v738_v14, %v535_v23  ;;  %857 = vmatprep.mubr.msk.f32.mxu1 %vm127_vm5, %v554_v19 }
 0x465   :  { %858 = vmatmul.mubr.msk.f32.vlgmr.msra.gmra.mrb[8].mxu1 %vm127_vm5, %v555_v21  ;;  %v557_v27 = vmax.f32 %v541_v22, 0.0 }
 0x466   :  { %v556_v25 = vmax.f32 %v536_v24, 0.0  ;;  %v848_v26 = vpop.f32.mrb[8].mxu0 }
 0x467   :  { %v551_v28 = vadd.f32 %v848_v26, %v738_v14  ;;  %v545_v29 = vpop.f32.mrb[9].mxu0 }
 0x468   :  { %v546_v30 = vadd.f32 %v738_v14, %v545_v29  ;;  %860 = vmatprep.mubr.msk.f32.mxu1 %vm127_vm5, %v556_v25 }
 0x469   :  { %861 = vmatmul.mubr.msk.f32.gmra.mrb[10].mxu1 %vm127_vm5, %v557_v27  ;;  %v559_v32 = vmax.f32 %v551_v28, 0.0 }
 0x46a   :  { %v558_v31 = vmax.f32 %v546_v30, 0.0 }
 0x46c   :  { %863 = vmatprep.mubr.msk.f32.mxu1 %vm127_vm5, %v558_v31 }
 0x46d   :  { %864 = vmatmul.mubr.msk.f32.gmra.mrb[12].mxu1 %vm127_vm5, %v559_v32 }
 0x538   :  { %v859_v34 = vpop.f32.mrb[8].mxu1 }
 0x539   :  { %v653_v35 = vpop.f32.mrb[9].mxu1  ;;  %v659_v37 = vadd.f32 %v859_v34, %v745_v33 }
 0x53a   :  { %v654_v36 = vadd.f32 %v745_v33, %v653_v35 }
 0x53b   :  { %v683_v42 = vsel %vm682_vm7, %v659_v37, 0.0 }
 0x53c   :  { %v862_v38 = vpop.f32.mrb[10].mxu1  ;;  %705 = vrot.lane.b32.xlu0 %v654_v36, %s944_s15 }
 0x53d   :  { %v663_v39 = vpop.f32.mrb[11].mxu1  ;;  %v669_v40 = vadd.f32 %v862_v38, %v745_v33 }
 0x53e   :  { %v664_v41 = vadd.f32 %v745_v33, %v663_v39 }
 0x53f   :  { %v686_v48 = vsel %vm682_vm7, %v669_v40, 0.0 }
 0x540   :  { %v684_v43 = vsel %vm682_vm7, %v664_v41, 0.0  ;;  %v865_v44 = vpop.f32.mrb[12].mxu1 }
 0x541   :  { %v685_v45 = vadd.f32 %v684_v43, %v683_v42  ;;  %v673_v46 = vpop.f32.mrb[13].mxu1  ;;  %v679_v49 = vadd.f32 %v865_v44, %v745_v33 }
 0x542   :  { %v674_v50 = vadd.f32 %v745_v33, %v673_v46 }
 0x543   :  { %v687_v51 = vadd.f32 %v686_v48, %v685_v45  ;;  %v690_v54 = vsel %vm682_vm7, %v679_v49, 0.0 }
 0x544   :  { %v688_v52 = vsel %vm682_vm7, %v674_v50, 0.0 }
 0x545   :  { %v689_v53 = vadd.f32 %v688_v52, %v687_v51 }
 0x547   :  { %v691_v55 = vadd.f32 %v690_v54, %v689_v53 }
 0x549   :  { %692 = vadd.xlane.f32.xlu1 %v691_v55 }
 0x5ae   :  { %v706_v63 = vpop.permute.xlu0 %705 }
 0x5af   :  { %v708_v0 = vadd.f32 %v706_v63, %v1018_v47 }
 0x5d6   :  { %v693_v56 = vpop.xlane.xlu1 %692 }
 0x5d7   :  { %v694_v57 = vrot.slane %v693_v56, 4 }
 0x5d9   :  { %v695_v58 = vadd.f32 %v694_v57, %v693_v56 }
 0x5db   :  { %v696_v59 = vrot.slane %v695_v58, 2 }
 0x5dd   :  { %v697_v60 = vadd.f32 %v696_v59, %v695_v58 }
 0x5df   :  { %v698_v61 = vrot.slane %v697_v60, 1 }
 0x5e1   :  { %v699_v62 = vadd.f32 %v698_v61, %v697_v60 }
 0x5e3   :  { %898 = vpush %v699_v62 }
 0x614   :  { %s899_s16 = spop %898 }
 0x615   :  { %s703_s17 = smul.f32 0.025, %s899_s16 }
 0x617   :  { %v709_v1 = vstv %s703_s17 }
 0x618   :  { %v710_v2 = vsub.f32 %v708_v0, %v709_v1 }
 0x61a   :  { %712 = vrot.lane.b32.xlu0 %v710_v2, %s945_s18 }
 0x68c   :  { %v713_v3 = vpop.permute.xlu0 %712 }
 0x68d   :  { %v716_v4 = vsel %vm715_vm8, %v1018_v47, %v713_v3 }
 0x68e   :  { %718 = vst.msk [vmem:[%s1042_s4] sm:$0xff] %vm717_vm9, %v716_v4 }
 0x68f   :  { %723 = vsyncpa [#allocation3], 1 }

</bundles_post_ra>
